<compile_context>
chip_gen: v5e
topology: v5e:2x2
jax: 0.10.0
libtpu: 0.0.40
codegen_flags: <defaults>
</compile_context>

<pallas_src>
import functools

import jax
import jax.numpy as jnp
from jax.experimental import pallas as pl
from jax.experimental.pallas import tpu as pltpu


# ----------------------------------------------------------------------------
# Parameter setup (glue): sinusoidal positional-encoding table, deterministic.
# ----------------------------------------------------------------------------
def make_pe_table(d_model: int, max_len: int = 650) -> jnp.ndarray:
    position = jnp.arange(0, max_len, dtype=jnp.float32)[:, None]          # (L, 1)
    div_term = jnp.exp(
        jnp.arange(0, d_model, 2, dtype=jnp.float32)
        * (-jnp.log(jnp.float32(10000.0)) / d_model)
    )                                                                       # (D/2,)
    sin = jnp.sin(position * div_term)                                      # (L, D/2)
    cos = jnp.cos(position * div_term)                                      # (L, D/2)
    # interleave -> pe[:, 0::2] = sin, pe[:, 1::2] = cos
    pe = jnp.stack([sin, cos], axis=-1).reshape(max_len, d_model)           # (L, D)
    return pe


# ----------------------------------------------------------------------------
# Pallas kernels (operate on lane-dense (TB, S*D) blocks)
# ----------------------------------------------------------------------------
def _pe_add_kernel(x_ref, pe_ref, o_ref):
    # eval mode: dropout is identity
    o_ref[...] = (x_ref[...] + pe_ref[...]).astype(o_ref.dtype)


def _pe_add_dropout_kernel(x_ref, pe_ref, bits_ref, o_ref, *, threshold, inv_keep):
    # training mode: inverted dropout, integer-threshold compare on raw bits
    y = x_ref[...] + pe_ref[...]
    keep = bits_ref[...] >= jnp.uint32(threshold)
    o_ref[...] = (jnp.where(keep, y, 0.0) * inv_keep).astype(o_ref.dtype)


# ----------------------------------------------------------------------------
# Wrapper
# ----------------------------------------------------------------------------
def _choose_tb(batch: int, row_bytes: int, target_bytes: int = 2 << 20) -> int:
    """Batches per block: aim for ~2 MiB of x per grid step, keep layout legal."""
    tb = max(1, target_bytes // max(row_bytes, 1))
    if tb >= batch:
        return batch                      # whole batch in one block
    if tb >= 8:
        tb = (tb // 8) * 8                # keep sublane dim a multiple of 8
    return max(1, min(tb, batch))


def positional_encoding(x, pe_table, *, dropout_p=0.0, training=False, rng_key=None):
    """x: (B, S, D). Returns x + pe[:S] (with inverted dropout if training)."""
    B, S, D = x.shape
    row = S * D
    itemsize = jnp.dtype(x.dtype).itemsize

    # Lane-dense view: last block dim is the full flattened row (multiple of
    # 128 for realistic S*D), so stores are unmasked even when D < 128.
    x2 = x.reshape(B, row)
    pe_row = pe_table[:S, :].reshape(1, row).astype(x.dtype)   # glue: slice + cast

    tb = _choose_tb(B, row * itemsize)
    grid = (pl.cdiv(B, tb),)

    x_spec = pl.BlockSpec((tb, row), lambda i: (i, 0))
    pe_spec = pl.BlockSpec((1, row), lambda i: (0, 0))
    out_spec = pl.BlockSpec((tb, row), lambda i: (i, 0))
    compiler_params = pltpu.CompilerParams(
        dimension_semantics=("parallel",),          # megacore-friendly on v7x
        vmem_limit_bytes=32 * 1024 * 1024,          # room for double-buffered blocks on v5e
    )

    if (not training) or dropout_p == 0.0:
        out2 = pl.pallas_call(
            _pe_add_kernel,
            out_shape=jax.ShapeDtypeStruct((B, row), x.dtype),
            grid_spec=pl.GridSpec(
                grid=grid,
                in_specs=[x_spec, pe_spec],
                out_specs=out_spec,
            ),
            compiler_params=compiler_params,
        )(x2, pe_row)
        return out2.reshape(B, S, D)

    if rng_key is None:
        rng_key = jax.random.PRNGKey(0)
    # Random bits from the framework RNG (glue); mask/select/scale stay in-kernel.
    bits = jax.random.bits(rng_key, (B, row), dtype=jnp.uint32)
    threshold = min(int(round(float(dropout_p) * (2.0 ** 32))), 2 ** 32 - 1)
    kernel = functools.partial(
        _pe_add_dropout_kernel,
        threshold=threshold,
        inv_keep=1.0 / (1.0 - float(dropout_p)),
    )
    bits_spec = pl.BlockSpec((tb, row), lambda i: (i, 0))

    out2 = pl.pallas_call(
        kernel,
        out_shape=jax.ShapeDtypeStruct((B, row), x.dtype),
        grid_spec=pl.GridSpec(
            grid=grid,
            in_specs=[x_spec, pe_spec, bits_spec],
            out_specs=out_spec,
        ),
        compiler_params=compiler_params,
    )(x2, pe_row, bits)
    return out2.reshape(B, S, D)


# ----------------------------------------------------------------------------
# Demo / correctness check
# ----------------------------------------------------------------------------
if __name__ == "__main__":
    B, S, D = 2, 8, 32          # batch, seq, d_model
    dropout_p = 0.1
    max_len = 650

    key = jax.random.PRNGKey(0)
    x = jax.random.normal(key, (B, S, D), dtype=jnp.float32)
    pe_table = make_pe_table(D, max_len)

    # Eval-mode forward (dropout == identity), implemented in Pallas.
    out = positional_encoding(x, pe_table, dropout_p=dropout_p, training=False)
    out = jax.block_until_ready(out)

    # Reference (plain JAX) for the deterministic eval path.
    ref = x + pe_table[None, :S, :]
    assert out.shape == (B, S, D) and out.dtype == x.dtype
    assert jnp.allclose(out, ref, atol=1e-6), "mismatch vs reference (eval path)"

    # Training-mode path: every element is either exactly dropped (0) or
    # exactly ref / (1 - p).
    out_train = positional_encoding(
        x, pe_table, dropout_p=dropout_p, training=True,
        rng_key=jax.random.PRNGKey(123),
    )
    out_train = jax.block_until_ready(out_train)
    assert out_train.shape == (B, S, D) and out_train.dtype == x.dtype
    scaled = ref / (1.0 - dropout_p)
    is_dropped = jnp.isclose(out_train, 0.0, atol=1e-6)
    is_kept = jnp.isclose(out_train, scaled, atol=1e-5)
    assert bool(jnp.all(is_dropped | is_kept)), "mismatch vs reference (dropout path)"

    print("KERNEL_OK")
</pallas_src>

<mosaic_0001>
module attributes {stable_mosaic.version = 11 : i64} {
  func.func @_pe_add_kernel(%arg0: i32, %arg1: memref<2x256xf32, #tpu.memory_space<vmem>>, %arg2: memref<1x256xf32, #tpu.memory_space<vmem>>, %arg3: memref<2x256xf32, #tpu.memory_space<vmem>>) attributes {dimension_semantics = [#tpu.dimension_semantics<parallel>], iteration_bounds = array<i64: 1>, scalar_prefetch = 0 : i64, scratch_operands = 0 : i64, tpu.core_type = #tpu.core_type<tc>, window_params = [{transform_indices = @transform_0, window_bounds = array<i64: 2, 256>}, {pipeline_mode = #tpu.pipeline_mode<synchronous>, transform_indices = @transform_1, window_bounds = array<i64: 1, 256>}, {transform_indices = @transform_2, window_bounds = array<i64: 2, 256>}]} {
    %c0 = arith.constant 0 : index
    %c0_0 = arith.constant 0 : index
    %0 = vector.load %arg1[%c0, %c0_0] : memref<2x256xf32, #tpu.memory_space<vmem>>, vector<2x256xf32>
    %c0_1 = arith.constant 0 : index
    %c0_2 = arith.constant 0 : index
    %1 = vector.load %arg2[%c0_1, %c0_2] : memref<1x256xf32, #tpu.memory_space<vmem>>, vector<1x256xf32>
    %2 = vector.broadcast %1 : vector<1x256xf32> to vector<2x256xf32>
    %3 = arith.addf %0, %2 : vector<2x256xf32>
    %c0_3 = arith.constant 0 : index
    %c0_4 = arith.constant 0 : index
    %4 = vector.load %arg3[%c0_3, %c0_4] : memref<2x256xf32, #tpu.memory_space<vmem>>, vector<2x256xf32>
    tpu.vector_store %arg3[%c0_3, %c0_4], %3 {strides = array<i32>} : memref<2x256xf32, #tpu.memory_space<vmem>>, vector<2x256xf32>,
    return
  }
  func.func @transform_0(%arg0: i32) -> (i32, i32) {
    %c0_i32 = arith.constant 0 : i32
    %c0_i32_0 = arith.constant 0 : i32
    return %arg0, %c0_i32 : i32, i32
  }
  func.func @transform_1(%arg0: i32) -> (i32, i32) {
    %c0_i32 = arith.constant 0 : i32
    %c0_i32_0 = arith.constant 0 : i32
    %c0_i32_1 = arith.constant 0 : i32
    return %c0_i32, %c0_i32_0 : i32, i32
  }
  func.func @transform_2(%arg0: i32) -> (i32, i32) {
    %c0_i32 = arith.constant 0 : i32
    %c0_i32_0 = arith.constant 0 : i32
    return %arg0, %c0_i32 : i32, i32
  }
}

</mosaic_0001>

<bundles_post_ra>
// kernel: tpu_custom_call.1
= control target key start
LH: loop header
LB: loop body
LE: loop exit
PB: predicated region body
PF: predicated region fallthrough
CT: control target
= control target key end

     0   :  { %7 = vsyncpa [#allocation3], 0  ;;  %s177_s0 = inlined_call_operand.hbm [shape: f32[2,256], index: 0, kind: input, shape index: {}]   ;;  %s178_s1 = inlined_call_operand.hbm [shape: f32[1,256], index: 1, kind: input, shape index: {}]   ;;  %s179_s2 = inlined_call_operand.hbm [shape: f32[2,256], index: 2, kind: output, shape index: {}]  }
   0x1   :  { %8 = vsyncpa [#allocation6], 0 }
   0x2   :  { %9 = vsyncpa [#allocation4], 0  ;;  %s15_s11 = sshll.u32 %s177_s0, 4  ;;  %s150_s12 = smov [#allocation2]   ;;  %s16_s11 = int_to_ptr.hbm [resolvable:$true] %s15_s11 }
   0x3   :  { %s17_s13 = sshll.u32 %s150_s12, 4  ;;  %s26_s16 = sshll.u32 %s178_s1, 4  ;;  %s18_s13 = int_to_ptr.vmem [resolvable:$true] %s17_s13  ;;  %s27_s16 = int_to_ptr.hbm [resolvable:$true] %s26_s16 }
   0x4   :  { %20 = dma.hbm_to_vmem [thread:$0]  %s16_s11, 64, %s18_s13, [#allocation3]  }
   0x5   :  { %s151_s17 = smov [#allocation5]  }
   0x6   :  { %s28_s18 = sshll.u32 %s151_s17, 4  ;;  %s29_s18 = int_to_ptr.vmem [resolvable:$true] %s28_s18 }
   0x7   :  { %31 = dma.hbm_to_vmem [thread:$0]  %s27_s16, 32, %s29_s18, [#allocation6]  }
   0x8   :  { %144 = dma.done.wait [#allocation3], 64  }
   0x9   :  { %145 = vsyncadd [#allocation3], 4294967232 }
   0xa   :  { %146 = dma.done.wait [#allocation6], 32  }
   0xb   :  { %147 = vsyncadd [#allocation6], 4294967264  ;;  %v41_v0 = vld [vmem:[#allocation5] sm:$0x3]  ;;  %vm46_vm0 = vcmask 1041408   ;;  %s152_s0 = smov [#allocation7]  }
   0xc   :  { %v43_v1 = vperm.slane %v41_v0, 0  ;;  %v44_v2 = vperm.slane %v41_v0, 1  ;;  %v40_v3 = vld [vmem:[#allocation2] sm:$0xf]  ;;  %s56_s19 = sshll.u32 %s152_s0, 4  ;;  %s58_s21 = sshll.u32 %s179_s2, 4  ;;  %s57_s19 = int_to_ptr.vmem [resolvable:$true] %s56_s19  ;;  %s59_s21 = int_to_ptr.hbm [resolvable:$true] %s58_s21 }
   0xe   :  { %v45_v4 = vrot.slane %v44_v2, 6 }
  0x10   :  { %v47_v5 = vsel %vm46_vm0, %v43_v1, %v45_v4 }
  0x11   :  { %v49_v6 = vadd.f32 %v47_v5, %v40_v3 }
  0x13   :  { %50 = vst [vmem:[#allocation7] sm:$0xf] %v49_v6 }
  0x14   :  { %61 = dma.vmem_to_hbm [thread:$0]  %s57_s19, 64, %s59_s21, [#allocation4]  }
  0x15   :  { %148 = dma.done.wait [#allocation4], 64  }
  0x16   :  { %149 = vsyncadd [#allocation4], 4294967232 }
  0x17   :  { %66 = vsyncpa [#allocation3], 1 }
  0x18   :  { %67 = vsyncpa [#allocation6], 1 }
  0x19   :  { %68 = vsyncpa [#allocation4], 1 }

</bundles_post_ra>
